<compile_context>
chip_gen: v5e
topology: v5e:2x2
jax: 0.10.0
libtpu: 0.0.40
codegen_flags: <defaults>
</compile_context>

<pallas_src>
import functools

import jax
import jax.numpy as jnp
from jax.experimental import pallas as pl
from jax.experimental.pallas import tpu as pltpu


def _round_up(n, m):
    return (n + m - 1) // m * m


def _cdiv(a, b):
    return (a + b - 1) // b


def _choose_pack(d_in, d_h, d_out):
    """Rows packed per stored row so the output row is 128 lanes wide."""
    if 0 < d_out < 128 and 128 % d_out == 0:
        pack = 128 // d_out
        # keep the block-diagonal weights tiny in VMEM
        if 4 * pack * pack * (d_in * d_h + d_h * d_h + d_h * d_out) <= (8 << 20):
            return pack
    # pack == 1 is correct but falls back to <128-lane masked stores (perf cliff).
    return 1


def _default_act_dtype(matmul_dtype):
    """bf16 bias/PReLU on v6e/v7x (halves VALU work); f32 on v5e (no bf16 VPU)."""
    if jnp.dtype(matmul_dtype) != jnp.dtype(jnp.bfloat16):
        return jnp.float32
    try:
        kind = jax.devices()[0].device_kind.lower()
    except Exception:
        kind = ""
    if "v5 lite" in kind or "v5e" in kind or "v5lite" in kind:
        return jnp.float32
    return jnp.bfloat16


def pack_encoder_params(w1, b1, w2, b2, w3, b3, prelu_alpha, *,
                        matmul_dtype=jnp.bfloat16, act_dtype=None):
    """Build block-diagonal weights / tiled biases for the packed kernel.

    Call ONCE per parameter set and reuse across forward calls.  Weights are
    expected pre-transposed to (in, out), i.e. PyTorch's `lin.weight.T`.
    """
    d_in, d_h = w1.shape
    d_out = w3.shape[1]
    matmul_dtype = jnp.dtype(matmul_dtype)
    act_dtype = jnp.dtype(_default_act_dtype(matmul_dtype) if act_dtype is None
                          else act_dtype)

    pack = _choose_pack(d_in, d_h, d_out)

    eye = jnp.eye(pack, dtype=jnp.float32)
    w1p = jnp.kron(eye, w1.astype(jnp.float32)).astype(matmul_dtype)
    w2p = jnp.kron(eye, w2.astype(jnp.float32)).astype(matmul_dtype)
    w3p = jnp.kron(eye, w3.astype(jnp.float32)).astype(matmul_dtype)
    b1p = jnp.tile(b1, pack).reshape(1, pack * d_h).astype(act_dtype)
    b2p = jnp.tile(b2, pack).reshape(1, pack * d_h).astype(act_dtype)
    b3p = jnp.tile(b3, pack).reshape(1, pack * d_out).astype(jnp.float32)
    alpha = prelu_alpha.reshape(1).astype(jnp.float32)        # SMEM scalar (f32)
    return dict(w1=w1p, b1=b1p, w2=w2p, b2=b2p, w3=w3p, b3=b3p, alpha=alpha)


def _encoder_kernel(alpha_ref, x_ref, w1_ref, b1_ref, w2_ref, b2_ref,
                    w3_ref, b3_ref, o_ref, *, act_dtype):
    """Fused 3-layer FFN on one packed batch tile.

    MXU matmuls run in the weights' dtype with f32 accumulation; bias add and
    the 3-op PReLU (cmp + mul + select) run on the VPU in `act_dtype`.
    """
    cd = w1_ref.dtype                                  # MXU operand dtype
    a = alpha_ref[0]                                   # PReLU slope (f32 scalar)

    def act(h_acc, b_ref):                             # bias + PReLU; dropout = identity (eval)
        h = h_acc.astype(act_dtype) + b_ref[...]
        return jnp.where(h > 0, h, a.astype(h.dtype) * h)

    x = x_ref[...].astype(cd)
    h1 = act(jnp.dot(x, w1_ref[...], preferred_element_type=jnp.float32), b1_ref)
    h2 = act(jnp.dot(h1.astype(cd), w2_ref[...], preferred_element_type=jnp.float32), b2_ref)
    h3 = jnp.dot(h2.astype(cd), w3_ref[...], preferred_element_type=jnp.float32)
    o_ref[...] = (h3 + b3_ref[...]).astype(o_ref.dtype)        # lin3: no activation


@functools.partial(jax.jit, static_argnames=("block_b", "out_dtype"))
def encoder_forward(x, params, *, block_b=4096, out_dtype=None):
    """x: [B, emb_dim] -> [B, bottleneck_dim] (eval-mode Encoder forward).

    `params` is the dict from pack_encoder_params (build once, reuse).  Pass x
    in bf16 to halve the dominant HBM stream; out_dtype defaults to x.dtype.
    """
    B, d_in = x.shape
    w1p, b1p = params["w1"], params["b1"]
    w2p, b2p = params["w2"], params["b2"]
    w3p, b3p = params["w3"], params["b3"]
    alpha = params["alpha"]

    pack = w1p.shape[0] // d_in
    d_h = w1p.shape[1] // pack
    d_out = w3p.shape[1] // pack
    act_dtype = b1p.dtype
    out_dtype = jnp.dtype(x.dtype if out_dtype is None else out_dtype)

    # Pack `pack` consecutive batch rows per stored row (lane-dense loads, VPU
    # ops and stores).  Only pad when B % pack != 0, and then by < pack rows;
    # the common divisible case is a free metadata-only reshape (no HBM copy).
    Bp = _round_up(B, pack)
    if Bp != B:
        x = jnp.pad(x, ((0, Bp - B), (0, 0)))          # bounded: < pack rows
    R = Bp // pack                                     # packed rows
    xp = x.reshape(R, pack * d_in)                     # free row-major reshape

    # Packed rows per grid step: sublane-aligned for the narrowest streamed
    # dtype, capped near block_b batch rows, and small enough that the grid has
    # >= 2 steps so both v7x TensorCores get work ("parallel" axis).
    align = max(32 // jnp.dtype(x.dtype).itemsize, 32 // out_dtype.itemsize)
    rp_cap = max(align, _round_up(block_b, align * pack) // pack)
    rp_half = _round_up(_cdiv(R, 2), align)
    rp = max(align, min(rp_cap, rp_half))
    grid = (_cdiv(R, rp),)
    # Ragged last tile: Pallas clamps the boundary DMAs -- out-of-bounds rows
    # are garbage on read (harmless: rows are independent) and discarded on
    # write.  No pad-to-block-multiple and no output slice copies needed.

    # Raise the scoped-VMEM limit only when a huge block_b would trip v5e's
    # 16 MiB default (double-buffered x/out tiles + resident weights).
    stream_bytes = rp * pack * (d_in * jnp.dtype(x.dtype).itemsize
                                + d_out * out_dtype.itemsize)
    weight_bytes = sum(int(a.size) * a.dtype.itemsize
                       for a in (w1p, b1p, w2p, b2p, w3p, b3p))
    vmem_need = 2 * stream_bytes + 2 * weight_bytes + (1 << 20)
    vmem_limit = min(vmem_need, 64 << 20) if vmem_need > (12 << 20) else None

    kernel = functools.partial(_encoder_kernel, act_dtype=act_dtype)
    const = lambda shape: pl.BlockSpec(shape, lambda i: (0, 0))   # VMEM-resident

    out_packed = pl.pallas_call(
        kernel,
        out_shape=jax.ShapeDtypeStruct((R, pack * d_out), out_dtype),
        grid=grid,
        in_specs=[
            pl.BlockSpec(memory_space=pltpu.MemorySpace.SMEM),    # PReLU alpha (f32)
            # (perf sweep knob: pipeline_mode=pl.Buffered(3) on v7x if traces
            #  show exposed DMA at step boundaries)
            pl.BlockSpec((rp, pack * d_in), lambda i: (i, 0)),    # packed x tile
            const((pack * d_in, pack * d_h)),                     # w1 (block-diag)
            const((1, pack * d_h)),                               # b1 (tiled)
            const((pack * d_h, pack * d_h)),                      # w2 (block-diag)
            const((1, pack * d_h)),                               # b2 (tiled)
            const((pack * d_h, pack * d_out)),                    # w3 (block-diag)
            const((1, pack * d_out)),                             # b3 (tiled)
        ],
        out_specs=pl.BlockSpec((rp, pack * d_out), lambda i: (i, 0)),
        compiler_params=pltpu.CompilerParams(
            dimension_semantics=("parallel",),
            vmem_limit_bytes=vmem_limit),
    )(alpha, xp, w1p, b1p, w2p, b2p, w3p, b3p)

    out = out_packed.reshape(Bp, d_out)                # free unpack
    if Bp != B:
        out = out[:B]
    return out


def _reference(x, w1, b1, w2, b2, w3, b3, a):
    prelu = lambda h: jnp.where(h > 0, h, a * h)
    h = prelu(x @ w1 + b1)
    h = prelu(h @ w2 + b2)
    return h @ w3 + b3


if __name__ == "__main__":
    # Shapes consistent with the module:
    #   emb_dim = 32, hidden_dim = 32, bottleneck_dim (emb_dim_autoenc_A) = 16
    B, D_EMB, D_HID, D_BOT = 200, 32, 32, 16

    key = jax.random.PRNGKey(0)
    ks = jax.random.split(key, 8)

    x = jax.random.normal(ks[0], (B, D_EMB), dtype=jnp.float32)

    # Parameters, already transposed to (in, out).
    w1 = jax.random.normal(ks[1], (D_EMB, D_HID), dtype=jnp.float32) * 0.1
    b1 = jax.random.normal(ks[2], (D_HID,), dtype=jnp.float32) * 0.1
    w2 = jax.random.normal(ks[3], (D_HID, D_HID), dtype=jnp.float32) * 0.1
    b2 = jax.random.normal(ks[4], (D_HID,), dtype=jnp.float32) * 0.1
    w3 = jax.random.normal(ks[5], (D_HID, D_BOT), dtype=jnp.float32) * 0.1
    b3 = jax.random.normal(ks[6], (D_BOT,), dtype=jnp.float32) * 0.1
    prelu_alpha = jnp.array([0.25], dtype=jnp.float32)   # nn.PReLU() default init

    ref = _reference(x, w1, b1, w2, b2, w3, b3, prelu_alpha[0])

    # (1) Exact f32 path: small tile -> multi-step ragged grid (25 packed rows,
    #     rp=8 -> grid=(4,), last tile partially out of bounds).  Matches the
    #     PyTorch f32 semantics tightly.
    p_f32 = pack_encoder_params(w1, b1, w2, b2, w3, b3, prelu_alpha,
                                matmul_dtype=jnp.float32)
    out_f32 = jax.block_until_ready(encoder_forward(x, p_f32, block_b=64))
    assert out_f32.shape == (B, D_BOT) and out_f32.dtype == jnp.float32
    assert jnp.allclose(out_f32, ref, atol=1e-3, rtol=1e-3)

    # (2) Default perf path: bf16 matmuls + bf16 bias/PReLU (f32 on v5e), f32
    #     in/out, >=2 grid steps.  Packed params built once and reused below.
    p_bf16 = pack_encoder_params(w1, b1, w2, b2, w3, b3, prelu_alpha)
    out_mix = jax.block_until_ready(encoder_forward(x, p_bf16))
    assert out_mix.shape == (B, D_BOT) and out_mix.dtype == jnp.float32
    assert jnp.allclose(out_mix, ref, atol=1e-1, rtol=1e-1)

    # (3) Fully bf16 streaming path (bf16 in -> bf16 out): halves HBM traffic
    #     of this memory-bound kernel.  The dtype change belongs at the source.
    x_bf16 = x.astype(jnp.bfloat16)
    out_bf16 = jax.block_until_ready(encoder_forward(x_bf16, p_bf16))
    assert out_bf16.shape == (B, D_BOT) and out_bf16.dtype == jnp.bfloat16
    assert jnp.allclose(out_bf16.astype(jnp.float32), ref, atol=1.5e-1, rtol=1.5e-1)

    print("KERNEL_OK")
</pallas_src>

<mosaic_0001>
module attributes {stable_mosaic.version = 11 : i64} {
  func.func @_encoder_kernel(%arg0: i32, %arg1: memref<1xf32, #tpu.memory_space<smem>>, %arg2: memref<8x256xf32, #tpu.memory_space<vmem>>, %arg3: memref<256x256xf32, #tpu.memory_space<vmem>>, %arg4: memref<1x256xf32, #tpu.memory_space<vmem>>, %arg5: memref<256x256xf32, #tpu.memory_space<vmem>>, %arg6: memref<1x256xf32, #tpu.memory_space<vmem>>, %arg7: memref<256x128xf32, #tpu.memory_space<vmem>>, %arg8: memref<1x128xf32, #tpu.memory_space<vmem>>, %arg9: memref<8x128xf32, #tpu.memory_space<vmem>>) attributes {dimension_semantics = [#tpu.dimension_semantics<parallel>], iteration_bounds = array<i64: 4>, scalar_prefetch = 0 : i64, scratch_operands = 0 : i64, tpu.core_type = #tpu.core_type<tc>, window_params = [{transform_indices = @transform_0, window_bounds = array<i64: 1>}, {transform_indices = @transform_1, window_bounds = array<i64: 8, 256>}, {pipeline_mode = #tpu.pipeline_mode<synchronous>, transform_indices = @transform_2, window_bounds = array<i64: 256, 256>}, {pipeline_mode = #tpu.pipeline_mode<synchronous>, transform_indices = @transform_3, window_bounds = array<i64: 1, 256>}, {pipeline_mode = #tpu.pipeline_mode<synchronous>, transform_indices = @transform_4, window_bounds = array<i64: 256, 256>}, {pipeline_mode = #tpu.pipeline_mode<synchronous>, transform_indices = @transform_5, window_bounds = array<i64: 1, 256>}, {pipeline_mode = #tpu.pipeline_mode<synchronous>, transform_indices = @transform_6, window_bounds = array<i64: 256, 128>}, {pipeline_mode = #tpu.pipeline_mode<synchronous>, transform_indices = @transform_7, window_bounds = array<i64: 1, 128>}, {transform_indices = @transform_8, window_bounds = array<i64: 8, 128>}]} {
    %c0 = arith.constant 0 : index
    %0 = memref.load %arg1[%c0] : memref<1xf32, #tpu.memory_space<smem>>
    %c0_0 = arith.constant 0 : index
    %c0_1 = arith.constant 0 : index
    %1 = vector.load %arg2[%c0_0, %c0_1] : memref<8x256xf32, #tpu.memory_space<vmem>>, vector<8x256xf32>
    %c0_2 = arith.constant 0 : index
    %c0_3 = arith.constant 0 : index
    %2 = vector.load %arg3[%c0_2, %c0_3] : memref<256x256xf32, #tpu.memory_space<vmem>>, vector<256x256xf32>
    %cst = arith.constant dense<0.000000e+00> : vector<8x256xf32>
    %3 = tpu.matmul %1, %2, %cst {dimension_numbers = #tpu.dot_dimension_numbers<[1], [0], [0], [1], [0, 0, 1, 1], [], []>} : vector<8x256xf32>, vector<256x256xf32>, vector<8x256xf32> -> vector<8x256xf32>
    %c0_4 = arith.constant 0 : index
    %c0_5 = arith.constant 0 : index
    %4 = vector.load %arg4[%c0_4, %c0_5] : memref<1x256xf32, #tpu.memory_space<vmem>>, vector<1x256xf32>
    %5 = vector.broadcast %4 : vector<1x256xf32> to vector<8x256xf32>
    %6 = arith.addf %3, %5 : vector<8x256xf32>
    %cst_6 = arith.constant 0.000000e+00 : f32
    %7 = vector.broadcast %cst_6 : f32 to vector<8x256xf32>
    %8 = arith.cmpf ogt, %6, %7 : vector<8x256xf32>
    %9 = vector.broadcast %0 : f32 to vector<8x256xf32>
    %10 = arith.mulf %9, %6 : vector<8x256xf32>
    %11 = arith.select %8, %6, %10 : vector<8x256xi1>, vector<8x256xf32>
    %c0_7 = arith.constant 0 : index
    %c0_8 = arith.constant 0 : index
    %12 = vector.load %arg5[%c0_7, %c0_8] : memref<256x256xf32, #tpu.memory_space<vmem>>, vector<256x256xf32>
    %cst_9 = arith.constant dense<0.000000e+00> : vector<8x256xf32>
    %13 = tpu.matmul %11, %12, %cst_9 {dimension_numbers = #tpu.dot_dimension_numbers<[1], [0], [0], [1], [0, 0, 1, 1], [], []>} : vector<8x256xf32>, vector<256x256xf32>, vector<8x256xf32> -> vector<8x256xf32>
    %c0_10 = arith.constant 0 : index
    %c0_11 = arith.constant 0 : index
    %14 = vector.load %arg6[%c0_10, %c0_11] : memref<1x256xf32, #tpu.memory_space<vmem>>, vector<1x256xf32>
    %15 = vector.broadcast %14 : vector<1x256xf32> to vector<8x256xf32>
    %16 = arith.addf %13, %15 : vector<8x256xf32>
    %cst_12 = arith.constant 0.000000e+00 : f32
    %17 = vector.broadcast %cst_12 : f32 to vector<8x256xf32>
    %18 = arith.cmpf ogt, %16, %17 : vector<8x256xf32>
    %19 = vector.broadcast %0 : f32 to vector<8x256xf32>
    %20 = arith.mulf %19, %16 : vector<8x256xf32>
    %21 = arith.select %18, %16, %20 : vector<8x256xi1>, vector<8x256xf32>
    %c0_13 = arith.constant 0 : index
    %c0_14 = arith.constant 0 : index
    %22 = vector.load %arg7[%c0_13, %c0_14] : memref<256x128xf32, #tpu.memory_space<vmem>>, vector<256x128xf32>
    %cst_15 = arith.constant dense<0.000000e+00> : vector<8x128xf32>
    %23 = tpu.matmul %21, %22, %cst_15 {dimension_numbers = #tpu.dot_dimension_numbers<[1], [0], [0], [1], [0, 0, 1, 1], [], []>} : vector<8x256xf32>, vector<256x128xf32>, vector<8x128xf32> -> vector<8x128xf32>
    %c0_16 = arith.constant 0 : index
    %c0_17 = arith.constant 0 : index
    %24 = vector.load %arg8[%c0_16, %c0_17] : memref<1x128xf32, #tpu.memory_space<vmem>>, vector<1x128xf32>
    %25 = vector.broadcast %24 : vector<1x128xf32> to vector<8x128xf32>
    %26 = arith.addf %23, %25 : vector<8x128xf32>
    %c0_18 = arith.constant 0 : index
    %c0_19 = arith.constant 0 : index
    %27 = vector.load %arg9[%c0_18, %c0_19] : memref<8x128xf32, #tpu.memory_space<vmem>>, vector<8x128xf32>
    tpu.vector_store %arg9[%c0_18, %c0_19], %26 {strides = array<i32>} : memref<8x128xf32, #tpu.memory_space<vmem>>, vector<8x128xf32>,
    return
  }
  func.func @transform_0(%arg0: i32) -> i32 {
    %c0_i32 = arith.constant 0 : i32
    %c0_i32_0 = arith.constant 0 : i32
    return %c0_i32 : i32
  }
  func.func @transform_1(%arg0: i32) -> (i32, i32) {
    %c0_i32 = arith.constant 0 : i32
    %c0_i32_0 = arith.constant 0 : i32
    return %arg0, %c0_i32 : i32, i32
  }
  func.func @transform_2(%arg0: i32) -> (i32, i32) {
    %c0_i32 = arith.constant 0 : i32
    %c0_i32_0 = arith.constant 0 : i32
    %c0_i32_1 = arith.constant 0 : i32
    return %c0_i32, %c0_i32_0 : i32, i32
  }
  func.func @transform_3(%arg0: i32) -> (i32, i32) {
    %c0_i32 = arith.constant 0 : i32
    %c0_i32_0 = arith.constant 0 : i32
    %c0_i32_1 = arith.constant 0 : i32
    return %c0_i32, %c0_i32_0 : i32, i32
  }
  func.func @transform_4(%arg0: i32) -> (i32, i32) {
    %c0_i32 = arith.constant 0 : i32
    %c0_i32_0 = arith.constant 0 : i32
    %c0_i32_1 = arith.constant 0 : i32
    return %c0_i32, %c0_i32_0 : i32, i32
  }
  func.func @transform_5(%arg0: i32) -> (i32, i32) {
    %c0_i32 = arith.constant 0 : i32
    %c0_i32_0 = arith.constant 0 : i32
    %c0_i32_1 = arith.constant 0 : i32
    return %c0_i32, %c0_i32_0 : i32, i32
  }
  func.func @transform_6(%arg0: i32) -> (i32, i32) {
    %c0_i32 = arith.constant 0 : i32
    %c0_i32_0 = arith.constant 0 : i32
    %c0_i32_1 = arith.constant 0 : i32
    return %c0_i32, %c0_i32_0 : i32, i32
  }
  func.func @transform_7(%arg0: i32) -> (i32, i32) {
    %c0_i32 = arith.constant 0 : i32
    %c0_i32_0 = arith.constant 0 : i32
    %c0_i32_1 = arith.constant 0 : i32
    return %c0_i32, %c0_i32_0 : i32, i32
  }
  func.func @transform_8(%arg0: i32) -> (i32, i32) {
    %c0_i32 = arith.constant 0 : i32
    %c0_i32_0 = arith.constant 0 : i32
    return %arg0, %c0_i32 : i32, i32
  }
}

</mosaic_0001>

<bundles_post_ra>
// kernel: encoder_forward.1
= control target key start
LH: loop header
LB: loop body
LE: loop exit
PB: predicated region body
PF: predicated region fallthrough
CT: control target
= control target key end

     0   :  { %s1239_s0 = inlined_call_operand.<no memory space> [shape: f32[1], index: 0, kind: input, shape index: {}]   ;;  %s1240_s1 = inlined_call_operand.vmem [shape: f32[25,256], index: 1, kind: input, shape index: {}]   ;;  %s1241_s2 = inlined_call_operand.vmem [shape: f32[256,256], index: 2, kind: input, shape index: {}]   ;;  %s1242_s3 = inlined_call_operand.vmem [shape: f32[1,256], index: 3, kind: input, shape index: {}]   ;;  %s1243_s4 = inlined_call_operand.hbm [shape: f32[256,256], index: 4, kind: input, shape index: {}]   ;;  %s1244_s5 = inlined_call_operand.vmem [shape: f32[1,256], index: 5, kind: input, shape index: {}]   ;;  %s1245_s6 = inlined_call_operand.hbm [shape: f32[256,128], index: 6, kind: input, shape index: {}]   ;;  %s1246_s7 = inlined_call_operand.vmem [shape: f32[1,128], index: 7, kind: input, shape index: {}]   ;;  %s1247_s8 = inlined_call_operand.vmem [shape: f32[25,128], index: 8, kind: output, shape index: {}]  }
   0x1   :  { %13 = sst [smem:[#allocation2]] %s1239_s0 }
   0x2   :  { %14 = vsyncpa [#allocation4], 0 }
   0x3   :  { %15 = vsyncpa [#allocation6], 0  ;;  %s986_s29 = smov 0  }
   0x4 LB: > { %s245_s10 = sshll.u32 %s1243_s4, 4  ;;  %s995_s11 = sadd.s32 4294967295, %s930_s29   ;;  %s930_s29 = sphi %s986_s29, %s21_s29   ;;  %s246_s10 = int_to_ptr.hbm [resolvable:$true] %s245_s10 }
   0x5   : > { %p809_p0 = scmp.ge.s32.totalorder %s930_s29, 1  ;;  %p225_p1 = scmp.lt.s32.totalorder %s930_s29, 5 }
   0x6   : > { %p837_p2 = scmp.eq.s32.totalorder %s995_s11, 0  ;;  %s932_s12 = smov [#allocation3]  }
   0x7   : > { %p1000_p3 = pnand %p809_p0, %p225_p1  ;;  %s247_s13 = sshll.u32 %s932_s12, 4  ;;  %s248_s13 = int_to_ptr.vmem [resolvable:$true] %s247_s13 }
   0x8   : > { %s262_s16 = sshll.u32 %s1245_s6, 4  ;;  %s933_s17 = smov [#allocation5]   ;;  %s263_s16 = int_to_ptr.hbm [resolvable:$true] %s262_s16 }
   0x9   : > { %p830_p4 = pneg %p1000_p3  ;;  %s264_s18 = sshll.u32 %s933_s17, 4  ;;  %s265_s18 = int_to_ptr.vmem [resolvable:$true] %s264_s18 }
   0xa   : > { %s934_s19 = smov 256   ;;  %s935_s20 = smov 16  }
   0xb   : > { %p831_p5 = pnand %p837_p2, %p830_p4  ;;  %s936_s21 = smov 128  }
   0xc   : > { %s937_s22 = smov 8   ;;  %291 = sbr.rel (%p1000_p3) target bundleno = 457 (0x1c9), region = 52 }
   0xd   : > { %833 = dma.hbm_to_vmem [thread:$0]  (!%p831_p5), %s246_s10, 8192, %s248_s13, [#allocation4], %s934_s19, %s934_s19, %s935_s20  }
   0xe   : > { %836 = dma.hbm_to_vmem [thread:$0]  (!%p831_p5), %s263_s16, 4096, %s265_s18, [#allocation6], %s936_s21, %s936_s21, %s937_s22  }
  0x11   : > { %921 = dma.done.wait (%p837_p2), [#allocation4], 8192  }
  0x12   : > { %923 = vsyncadd (%p837_p2), [#allocation4], 4294959104 }
  0x13   : > { %925 = dma.done.wait (%p837_p2), [#allocation6], 4096  }
  0x14   : > { %927 = vsyncadd (%p837_p2), [#allocation6], 4294963200  ;;  %v373_v0 = vld [vmem:[%s1241_s2 + $0xf8] sm:$0xff]  ;;  %v372_v1 = vld [vmem:[%s1241_s2 + $0xf0] sm:$0xff]  ;;  %p330_p6 = scmp.lt.s32.totalorder %s995_s11, 3  ;;  %s339_s10 = sld [smem:[#allocation2]] }
  0x15   : > { %v371_v2 = vld [vmem:[%s1241_s2 + $0xe8] sm:$0xff]  ;;  %452 = vmatpush.msra.mxu2 %v373_v0  ;;  %412 = vmatpush.msra.mxu0 %v372_v1  ;;  %v405_v3 = vld [vmem:[%s1241_s2 + $0x1f8] sm:$0xff]  ;;  %v370_v4 = vld [vmem:[%s1241_s2 + $0xe0] sm:$0xff] }
  0x16   : > { %v404_v5 = vld [vmem:[%s1241_s2 + $0x1f0] sm:$0xff]  ;;  %472 = vmatpush.msra.mxu3 %v405_v3  ;;  %v369_v6 = vld [vmem:[%s1241_s2 + $0xd8] sm:$0xff]  ;;  %v403_v7 = vld [vmem:[%s1241_s2 + $0x1e8] sm:$0xff]  ;;  %s1250_s11 = smov (!%p330_p6, %s995_s11), 3 }
  0x17   : > { %432 = vmatpush.msra.mxu1 %v404_v5  ;;  %v368_v8 = vld [vmem:[%s1241_s2 + $0xd0] sm:$0xff]  ;;  %453 = vmatpush.msra.mxu2 %v371_v2  ;;  %v402_v9 = vld [vmem:[%s1241_s2 + $0x1e0] sm:$0xff]  ;;  %v401_v10 = vld [vmem:[%s1241_s2 + $0x1d8] sm:$0xff]  ;;  %s821_s22 = sshll.u32 %s1250_s11, 4  ;;  %s818_s15 = sshll.u32 %s1250_s11, 3 }
  0x18   : > { %413 = vmatpush.msra.mxu0 %v370_v4  ;;  %473 = vmatpush.msra.mxu3 %v403_v7  ;;  %v367_v11 = vld [vmem:[%s1241_s2 + $0xc8] sm:$0xff]  ;;  %v366_v12 = vld [vmem:[%s1241_s2 + $0xc0] sm:$0xff]  ;;  %v400_v13 = vld [vmem:[%s1241_s2 + $0x1d0] sm:$0xff]  ;;  %s334_s16 = scalar_lea.vmem %s1240_s1, %s821_s22  ;;  %s338_s18 = scalar_lea.vmem %s1247_s8, %s818_s15 }
  0x19   : > { %433 = vmatpush.msra.mxu1 %v402_v9  ;;  %454 = vmatpush.msra.mxu2 %v369_v6  ;;  %v399_v14 = vld [vmem:[%s1241_s2 + $0x1c8] sm:$0xff]  ;;  %v398_v15 = vld [vmem:[%s1241_s2 + $0x1c0] sm:$0xff]  ;;  %v365_v16 = vld [vmem:[%s1241_s2 + $0xb8] sm:$0xff] }
  0x1a   : > { %414 = vmatpush.msra.mxu0 %v368_v8  ;;  %474 = vmatpush.msra.mxu3 %v401_v10  ;;  %v364_v17 = vld [vmem:[%s1241_s2 + $0xb0] sm:$0xff]  ;;  %v397_v18 = vld [vmem:[%s1241_s2 + $0x1b8] sm:$0xff]  ;;  %v363_v20 = vld [vmem:[%s1241_s2 + $0xa8] sm:$0xff] }
  0x1b   : > { %434 = vmatpush.msra.mxu1 %v400_v13  ;;  %455 = vmatpush.msra.mxu2 %v367_v11  ;;  %v396_v19 = vld [vmem:[%s1241_s2 + $0x1b0] sm:$0xff]  ;;  %v362_v21 = vld [vmem:[%s1241_s2 + $0xa0] sm:$0xff]  ;;  %v395_v22 = vld [vmem:[%s1241_s2 + $0x1a8] sm:$0xff] }
  0x1c   : > { %415 = vmatpush.msra.mxu0 %v366_v12  ;;  %475 = vmatpush.msra.mxu3 %v399_v14  ;;  %v394_v23 = vld [vmem:[%s1241_s2 + $0x1a0] sm:$0xff]  ;;  %v361_v24 = vld [vmem:[%s1241_s2 + $0x98] sm:$0xff]  ;;  %v360_v25 = vld [vmem:[%s1241_s2 + $0x90] sm:$0xff] }
  0x1d   : > { %435 = vmatpush.msra.mxu1 %v398_v15  ;;  %456 = vmatpush.msra.mxu2 %v365_v16  ;;  %v393_v26 = vld [vmem:[%s1241_s2 + $0x198] sm:$0xff]  ;;  %v392_v27 = vld [vmem:[%s1241_s2 + $0x190] sm:$0xff]  ;;  %v359_v28 = vld [vmem:[%s1241_s2 + $0x88] sm:$0xff] }
  0x1e   : > { %416 = vmatpush.msra.mxu0 %v364_v17  ;;  %476 = vmatpush.msra.mxu3 %v397_v18  ;;  %v358_v29 = vld [vmem:[%s1241_s2 + $0x80] sm:$0xff]  ;;  %v391_v30 = vld [vmem:[%s1241_s2 + $0x188] sm:$0xff]  ;;  %v357_v32 = vld [vmem:[%s1241_s2 + $0x78] sm:$0xff] }
  0x1f   : > { %436 = vmatpush.msra.mxu1 %v396_v19  ;;  %457 = vmatpush.msra.mxu2 %v363_v20  ;;  %v390_v31 = vld [vmem:[%s1241_s2 + $0x180] sm:$0xff]  ;;  %v356_v33 = vld [vmem:[%s1241_s2 + $0x70] sm:$0xff]  ;;  %v389_v34 = vld [vmem:[%s1241_s2 + $0x178] sm:$0xff] }
  0x20   : > { %417 = vmatpush.msra.mxu0 %v362_v21  ;;  %477 = vmatpush.msra.mxu3 %v395_v22  ;;  %v388_v35 = vld [vmem:[%s1241_s2 + $0x170] sm:$0xff]  ;;  %v355_v36 = vld [vmem:[%s1241_s2 + $0x68] sm:$0xff]  ;;  %v354_v37 = vld [vmem:[%s1241_s2 + $0x60] sm:$0xff] }
  0x21   : > { %437 = vmatpush.msra.mxu1 %v394_v23  ;;  %458 = vmatpush.msra.mxu2 %v361_v24  ;;  %v387_v38 = vld [vmem:[%s1241_s2 + $0x168] sm:$0xff]  ;;  %v386_v39 = vld [vmem:[%s1241_s2 + $0x160] sm:$0xff]  ;;  %v353_v40 = vld [vmem:[%s1241_s2 + $0x58] sm:$0xff] }
  0x22   : > { %418 = vmatpush.msra.mxu0 %v360_v25  ;;  %478 = vmatpush.msra.mxu3 %v393_v26  ;;  %v352_v41 = vld [vmem:[%s1241_s2 + $0x50] sm:$0xff]  ;;  %v385_v42 = vld [vmem:[%s1241_s2 + $0x158] sm:$0xff]  ;;  %v351_v44 = vld [vmem:[%s1241_s2 + $0x48] sm:$0xff] }
  0x23   : > { %438 = vmatpush.msra.mxu1 %v392_v27  ;;  %459 = vmatpush.msra.mxu2 %v359_v28  ;;  %v384_v43 = vld [vmem:[%s1241_s2 + $0x150] sm:$0xff]  ;;  %v350_v45 = vld [vmem:[%s1241_s2 + $0x40] sm:$0xff]  ;;  %v383_v46 = vld [vmem:[%s1241_s2 + $0x148] sm:$0xff] }
  0x24   : > { %419 = vmatpush.msra.mxu0 %v358_v29  ;;  %479 = vmatpush.msra.mxu3 %v391_v30  ;;  %v382_v47 = vld [vmem:[%s1241_s2 + $0x140] sm:$0xff]  ;;  %v349_v48 = vld [vmem:[%s1241_s2 + $0x38] sm:$0xff]  ;;  %v348_v49 = vld [vmem:[%s1241_s2 + $0x30] sm:$0xff] }
  0x25   : > { %439 = vmatpush.msra.mxu1 %v390_v31  ;;  %460 = vmatpush.msra.mxu2 %v357_v32  ;;  %v381_v50 = vld [vmem:[%s1241_s2 + $0x138] sm:$0xff]  ;;  %v380_v51 = vld [vmem:[%s1241_s2 + $0x130] sm:$0xff]  ;;  %v347_v52 = vld [vmem:[%s1241_s2 + $0x28] sm:$0xff] }
  0x26   : > { %420 = vmatpush.msra.mxu0 %v356_v33  ;;  %480 = vmatpush.msra.mxu3 %v389_v34  ;;  %v346_v53 = vld [vmem:[%s1241_s2 + $0x20] sm:$0xff]  ;;  %v379_v54 = vld [vmem:[%s1241_s2 + $0x128] sm:$0xff]  ;;  %v345_v56 = vld [vmem:[%s1241_s2 + $0x18] sm:$0xff] }
  0x27   : > { %440 = vmatpush.msra.mxu1 %v388_v35  ;;  %461 = vmatpush.msra.mxu2 %v355_v36  ;;  %v378_v55 = vld [vmem:[%s1241_s2 + $0x120] sm:$0xff]  ;;  %v344_v57 = vld [vmem:[%s1241_s2 + $0x10] sm:$0xff]  ;;  %v377_v58 = vld [vmem:[%s1241_s2 + $0x118] sm:$0xff] }
  0x28   : > { %421 = vmatpush.msra.mxu0 %v354_v37  ;;  %481 = vmatpush.msra.mxu3 %v387_v38  ;;  %v376_v59 = vld [vmem:[%s1241_s2 + $0x110] sm:$0xff]  ;;  %v343_v60 = vld [vmem:[%s1241_s2 + $0x8] sm:$0xff]  ;;  %v342_v61 = vld [vmem:[%s1241_s2] sm:$0xff] }
  0x29   : > { %441 = vmatpush.msra.mxu1 %v386_v39  ;;  %462 = vmatpush.msra.mxu2 %v353_v40  ;;  %v340_v62 = vld [vmem:[%s334_s16] sm:$0xff]  ;;  %v375_v63 = vld [vmem:[%s1241_s2 + $0x108] sm:$0xff]  ;;  %v529_v2 = vld [vmem:[#allocation3 + $0xf0] sm:$0xff] }
  0x2a   : > { %422 = vmatpush.msra.mxu0 %v352_v41  ;;  %482 = vmatpush.msra.mxu3 %v385_v42  ;;  %v341_v0 = vld [vmem:[%s334_s16 + $0x8] sm:$0xff]  ;;  %v374_v1 = vld [vmem:[%s1241_s2 + $0x100] sm:$0xff]  ;;  %v530_v3 = vld [vmem:[#allocation3 + $0xf8] sm:$0xff] }
  0x2b   : > { %442 = vmatpush.msra.mxu1 %v384_v43  ;;  %463 = vmatpush.msra.mxu2 %v351_v44  ;;  %v527_v4 = vld [vmem:[#allocation3 + $0xe0] sm:$0xff]  ;;  %v561_v5 = vld [vmem:[#allocation3 + $0x1f0] sm:$0xff]  ;;  %v528_v6 = vld [vmem:[#allocation3 + $0xe8] sm:$0xff] }
  0x2c   : > { %423 = vmatpush.msra.mxu0 %v350_v45  ;;  %483 = vmatpush.msra.mxu3 %v383_v46  ;;  %v562_v7 = vld [vmem:[#allocation3 + $0x1f8] sm:$0xff]  ;;  %v525_v8 = vld [vmem:[#allocation3 + $0xd0] sm:$0xff]  ;;  %v559_v9 = vld [vmem:[#allocation3 + $0x1e0] sm:$0xff] }
  0x2d   : > { %443 = vmatpush.msra.mxu1 %v382_v47  ;;  %464 = vmatpush.msra.mxu2 %v349_v48  ;;  %v526_v10 = vld [vmem:[#allocation3 + $0xd8] sm:$0xff]  ;;  %v560_v11 = vld [vmem:[#allocation3 + $0x1e8] sm:$0xff]  ;;  %v523_v12 = vld [vmem:[#allocation3 + $0xc0] sm:$0xff] }
  0x2e   : > { %424 = vmatpush.msra.mxu0 %v348_v49  ;;  %484 = vmatpush.msra.mxu3 %v381_v50  ;;  %v557_v13 = vld [vmem:[#allocation3 + $0x1d0] sm:$0xff]  ;;  %v524_v14 = vld [vmem:[#allocation3 + $0xc8] sm:$0xff]  ;;  %v558_v15 = vld [vmem:[#allocation3 + $0x1d8] sm:$0xff] }
  0x2f   : > { %444 = vmatpush.msra.mxu1 %v380_v51  ;;  %465 = vmatpush.msra.mxu2 %v347_v52  ;;  %v521_v16 = vld [vmem:[#allocation3 + $0xb0] sm:$0xff]  ;;  %v555_v17 = vld [vmem:[#allocation3 + $0x1c0] sm:$0xff]  ;;  %v522_v18 = vld [vmem:[#allocation3 + $0xb8] sm:$0xff] }
  0x30   : > { %425 = vmatpush.msra.mxu0 %v346_v53  ;;  %485 = vmatpush.msra.mxu3 %v379_v54  ;;  %v556_v19 = vld [vmem:[#allocation3 + $0x1c8] sm:$0xff]  ;;  %v519_v20 = vld [vmem:[#allocation3 + $0xa0] sm:$0xff]  ;;  %v553_v21 = vld [vmem:[#allocation3 + $0x1b0] sm:$0xff] }
  0x31   : > { %445 = vmatpush.msra.mxu1 %v378_v55  ;;  %466 = vmatpush.msra.mxu2 %v345_v56  ;;  %v520_v22 = vld [vmem:[#allocation3 + $0xa8] sm:$0xff]  ;;  %v554_v23 = vld [vmem:[#allocation3 + $0x1b8] sm:$0xff]  ;;  %v517_v24 = vld [vmem:[#allocation3 + $0x90] sm:$0xff] }
  0x32   : > { %426 = vmatpush.msra.mxu0 %v344_v57  ;;  %486 = vmatpush.msra.mxu3 %v377_v58  ;;  %v551_v25 = vld [vmem:[#allocation3 + $0x1a0] sm:$0xff]  ;;  %v518_v26 = vld [vmem:[#allocation3 + $0x98] sm:$0xff]  ;;  %v552_v27 = vld [vmem:[#allocation3 + $0x1a8] sm:$0xff] }
  0x33   : > { %446 = vmatpush.msra.mxu1 %v376_v59  ;;  %467 = vmatpush.msra.mxu2 %v343_v60  ;;  %v515_v28 = vld [vmem:[#allocation3 + $0x80] sm:$0xff]  ;;  %v549_v29 = vld [vmem:[#allocation3 + $0x190] sm:$0xff]  ;;  %v516_v30 = vld [vmem:[#allocation3 + $0x88] sm:$0xff] }
  0x34   : > { %427 = vmatpush.msra.mxu0 %v342_v61  ;;  %468 = vmatmul.f32.vlgmr.msra.gmra.mxu2 %v340_v62  ;;  %v550_v31 = vld [vmem:[#allocation3 + $0x198] sm:$0xff]  ;;  %v513_v32 = vld [vmem:[#allocation3 + $0x70] sm:$0xff]  ;;  %v547_v33 = vld [vmem:[#allocation3 + $0x180] sm:$0xff] }
  0x35   : > { %487 = vmatpush.msra.mxu3 %v375_v63  ;;  %428 = vmatmul.f32.vlgmr.msra.gmra.mxu0 %v340_v62  ;;  %v514_v34 = vld [vmem:[#allocation3 + $0x78] sm:$0xff]  ;;  %v548_v35 = vld [vmem:[#allocation3 + $0x188] sm:$0xff]  ;;  %v511_v36 = vld [vmem:[#allocation3 + $0x60] sm:$0xff] }
  0x36   : > { %488 = vmatmul.f32.vlgmr.msra.gmra.mxu3 %v341_v0  ;;  %447 = vmatpush.msra.mxu1 %v374_v1  ;;  %v545_v37 = vld [vmem:[#allocation3 + $0x170] sm:$0xff]  ;;  %v512_v38 = vld [vmem:[#allocation3 + $0x68] sm:$0xff]  ;;  %v546_v39 = vld [vmem:[#allocation3 + $0x178] sm:$0xff] }
  0x37   : > { %569 = vmatpush.msrb.mxu0 %v529_v2  ;;  %448 = vmatmul.f32.vlgmr.msra.gmra.mxu1 %v341_v0  ;;  %v509_v40 = vld [vmem:[#allocation3 + $0x50] sm:$0xff]  ;;  %v543_v41 = vld [vmem:[#allocation3 + $0x160] sm:$0xff]  ;;  %v510_v42 = vld [vmem:[#allocation3 + $0x58] sm:$0xff] }
  0x38   : > { %609 = vmatpush.msrb.mxu2 %v530_v3  ;;  %589 = vmatpush.msrb.mxu1 %v561_v5  ;;  %v544_v43 = vld [vmem:[#allocation3 + $0x168] sm:$0xff]  ;;  %v507_v44 = vld [vmem:[#allocation3 + $0x40] sm:$0xff]  ;;  %v505_v46 = vld [vmem:[#allocation3 + $0x30] sm:$0xff] }
  0x39   : > { %570 = vmatpush.msrb.mxu0 %v527_v4  ;;  %629 = vmatpush.msrb.mxu3 %v562_v7  ;;  %v508_v45 = vld [vmem:[#allocation3 + $0x48] sm:$0xff]  ;;  %v541_v47 = vld [vmem:[#allocation3 + $0x150] sm:$0xff]  ;;  %v506_v48 = vld [vmem:[#allocation3 + $0x38] sm:$0xff] }
  0x3a   : > { %610 = vmatpush.msrb.mxu2 %v528_v6  ;;  %590 = vmatpush.msrb.mxu1 %v559_v9  ;;  %v542_v49 = vld [vmem:[#allocation3 + $0x158] sm:$0xff]  ;;  %v503_v50 = vld [vmem:[#allocation3 + $0x20] sm:$0xff]  ;;  %v504_v52 = vld [vmem:[#allocation3 + $0x28] sm:$0xff] }
  0x3b   : > { %571 = vmatpush.msrb.mxu0 %v525_v8  ;;  %630 = vmatpush.msrb.mxu3 %v560_v11  ;;  %v539_v51 = vld [vmem:[#allocation3 + $0x140] sm:$0xff]  ;;  %v540_v53 = vld [vmem:[#allocation3 + $0x148] sm:$0xff]  ;;  %v501_v54 = vld [vmem:[#allocation3 + $0x10] sm:$0xff] }
  0x3c   : > { %611 = vmatpush.msrb.mxu2 %v526_v10  ;;  %591 = vmatpush.msrb.mxu1 %v557_v13  ;;  %v537_v55 = vld [vmem:[#allocation3 + $0x130] sm:$0xff]  ;;  %v502_v56 = vld [vmem:[#allocation3 + $0x18] sm:$0xff]  ;;  %v499_v58 = vld [vmem:[#allocation3] sm:$0xff] }
  0x3d   : > { %572 = vmatpush.msrb.mxu0 %v523_v12  ;;  %631 = vmatpush.msrb.mxu3 %v558_v15  ;;  %v538_v57 = vld [vmem:[#allocation3 + $0x138] sm:$0xff]  ;;  %v535_v59 = vld [vmem:[#allocation3 + $0x120] sm:$0xff]  ;;  %v500_v60 = vld [vmem:[#allocation3 + $0x8] sm:$0xff] }
  0x3e   : > { %612 = vmatpush.msrb.mxu2 %v524_v14  ;;  %592 = vmatpush.msrb.mxu1 %v555_v17  ;;  %v536_v61 = vld [vmem:[#allocation3 + $0x128] sm:$0xff]  ;;  %v533_v62 = vld [vmem:[#allocation3 + $0x110] sm:$0xff]  ;;  %v534_v63 = vld [vmem:[#allocation3 + $0x118] sm:$0xff] }
  0x3f   : > { %573 = vmatpush.msrb.mxu0 %v521_v16  ;;  %632 = vmatpush.msrb.mxu3 %v556_v19  ;;  %v531_v0 = vld [vmem:[#allocation3 + $0x100] sm:$0xff]  ;;  %v532_v1 = vld [vmem:[#allocation3 + $0x108] sm:$0xff]  ;;  %v670_v2 = vld [vmem:[#allocation5 + $0x78] sm:$0xff] }
  0x40   : > { %613 = vmatpush.msrb.mxu2 %v522_v18  ;;  %593 = vmatpush.msrb.mxu1 %v553_v21  ;;  %v669_v3 = vld [vmem:[#allocation5 + $0x70] sm:$0xff]  ;;  %v686_v4 = vld [vmem:[#allocation5 + $0xf8] sm:$0xff]  ;;  %v668_v5 = vld [vmem:[#allocation5 + $0x68] sm:$0xff] }
  0x41   : > { %574 = vmatpush.msrb.mxu0 %v519_v20  ;;  %633 = vmatpush.msrb.mxu3 %v554_v23  ;;  %v685_v6 = vld [vmem:[#allocation5 + $0xf0] sm:$0xff]  ;;  %v684_v7 = vld [vmem:[#allocation5 + $0xe8] sm:$0xff]  ;;  %v667_v8 = vld [vmem:[#allocation5 + $0x60] sm:$0xff] }
  0x42   : > { %614 = vmatpush.msrb.mxu2 %v520_v22  ;;  %594 = vmatpush.msrb.mxu1 %v551_v25  ;;  %v683_v9 = vld [vmem:[#allocation5 + $0xe0] sm:$0xff]  ;;  %v666_v10 = vld [vmem:[#allocation5 + $0x58] sm:$0xff]  ;;  %v665_v12 = vld [vmem:[#allocation5 + $0x50] sm:$0xff] }
  0x43   : > { %575 = vmatpush.msrb.mxu0 %v517_v24  ;;  %634 = vmatpush.msrb.mxu3 %v552_v27  ;;  %v682_v11 = vld [vmem:[#allocation5 + $0xd8] sm:$0xff]  ;;  %v681_v13 = vld [vmem:[#allocation5 + $0xd0] sm:$0xff]  ;;  %v664_v14 = vld [vmem:[#allocation5 + $0x48] sm:$0xff] }
  0x44   : > { %615 = vmatpush.msrb.mxu2 %v518_v26  ;;  %595 = vmatpush.msrb.mxu1 %v549_v29  ;;  %v680_v15 = vld [vmem:[#allocation5 + $0xc8] sm:$0xff]  ;;  %v663_v16 = vld [vmem:[#allocation5 + $0x40] sm:$0xff]  ;;  %v662_v19 = vld [vmem:[#allocation5 + $0x38] sm:$0xff]  ;;  %v494_v26 = vstv %s339_s10 }
  0x45   : > { %576 = vmatpush.msrb.mxu0 %v515_v28  ;;  %635 = vmatpush.msrb.mxu3 %v550_v31  ;;  %v406_v17 = vld [vmem:[%s1242_s3] sm:$0x3]  ;;  %v661_v21 = vld [vmem:[#allocation5 + $0x30] sm:$0xff]  ;;  %v660_v22 = vld [vmem:[#allocation5 + $0x28] sm:$0xff] }
  0x46   : > { %616 = vmatpush.msrb.mxu2 %v516_v30  ;;  %596 = vmatpush.msrb.mxu1 %v547_v33  ;;  %v679_v18 = vld [vmem:[#allocation5 + $0xc0] sm:$0xff]  ;;  %v408_v20 = vperm.slane %v406_v17, 0  ;;  %v409_v27 = vperm.slane %v406_v17, 1 }
  0x47   : > { %577 = vmatpush.msrb.mxu0 %v513_v32  ;;  %636 = vmatpush.msrb.mxu3 %v548_v35 }
  0x48   : > { %617 = vmatpush.msrb.mxu2 %v514_v34  ;;  %597 = vmatpush.msrb.mxu1 %v545_v37  ;;  %v659_v37 = vld [vmem:[#allocation5 + $0x20] sm:$0xff] }
  0x49   : > { %578 = vmatpush.msrb.mxu0 %v511_v36  ;;  %637 = vmatpush.msrb.mxu3 %v546_v39  ;;  %v658_v39 = vld [vmem:[#allocation5 + $0x18] sm:$0xff] }
  0x4a   : > { %618 = vmatpush.msrb.mxu2 %v512_v38  ;;  %598 = vmatpush.msrb.mxu1 %v543_v41  ;;  %v678_v38 = vld [vmem:[#allocation5 + $0xb8] sm:$0xff]  ;;  %v657_v41 = vld [vmem:[#allocation5 + $0x10] sm:$0xff] }
  0x4b   : > { %579 = vmatpush.msrb.mxu0 %v509_v40  ;;  %638 = vmatpush.msrb.mxu3 %v544_v43  ;;  %v677_v40 = vld [vmem:[#allocation5 + $0xb0] sm:$0xff]  ;;  %v656_v43 = vld [vmem:[#allocation5 + $0x8] sm:$0xff] }
  0x4c   : > { %619 = vmatpush.msrb.mxu2 %v510_v42  ;;  %599 = vmatpush.msrb.mxu1 %v541_v47  ;;  %v676_v42 = vld [vmem:[#allocation5 + $0xa8] sm:$0xff]  ;;  %v673_v47 = vld [vmem:[#allocation5 + $0x90] sm:$0xff] }
  0x4d   : > { %580 = vmatpush.msrb.mxu0 %v507_v44  ;;  %639 = vmatpush.msrb.mxu3 %v542_v49  ;;  %v675_v44 = vld [vmem:[#allocation5 + $0xa0] sm:$0xff] }
  0x4e   : > { %620 = vmatpush.msrb.mxu2 %v508_v45  ;;  %600 = vmatpush.msrb.mxu1 %v539_v51  ;;  %v655_v45 = vld [vmem:[#allocation5] sm:$0xff] }
  0x4f   : > { %581 = vmatpush.msrb.mxu0 %v505_v46  ;;  %640 = vmatpush.msrb.mxu3 %v540_v53  ;;  %v674_v46 = vld [vmem:[#allocation5 + $0x98] sm:$0xff]  ;;  %v671_v49 = vld [vmem:[#allocation5 + $0x80] sm:$0xff] }
  0x50   : > { %621 = vmatpush.msrb.mxu2 %v506_v48  ;;  %601 = vmatpush.msrb.mxu1 %v537_v55  ;;  %v672_v48 = vld [vmem:[#allocation5 + $0x88] sm:$0xff] }
  0x51   : > { %582 = vmatpush.msrb.mxu0 %v503_v50  ;;  %641 = vmatpush.msrb.mxu3 %v538_v57  ;;  %v563_v50 = vld [vmem:[%s1244_s5] sm:$0x3] }
  0x52   : > { %622 = vmatpush.msrb.mxu2 %v504_v52  ;;  %602 = vmatpush.msrb.mxu1 %v535_v59  ;;  %v565_v51 = vperm.slane %v563_v50, 0 }
  0x53   : > { %583 = vmatpush.msrb.mxu0 %v501_v54  ;;  %642 = vmatpush.msrb.mxu3 %v536_v61 }
  0x54   : > { %623 = vmatpush.msrb.mxu2 %v502_v56  ;;  %603 = vmatpush.msrb.mxu1 %v533_v62  ;;  %v566_v56 = vperm.slane %v563_v50, 1 }
  0x55   : > { %584 = vmatpush.msrb.mxu0 %v499_v58  ;;  %643 = vmatpush.msrb.mxu3 %v534_v63 }
  0x56   : > { %624 = vmatpush.msrb.mxu2 %v500_v60  ;;  %604 = vmatpush.msrb.mxu1 %v531_v0 }
  0x57   : > { %644 = vmatpush.msrb.mxu3 %v532_v1  ;;  %691 = vmatpush.msra.mxu0 %v670_v2  ;;  %v855_v1 = vld [vmem:[%s1246_s7] ss:$0 sm:$0xff] }
  0x58   : > { %711 = vmatpush.msra.mxu1 %v686_v4 }
  0x59   : > { %692 = vmatpush.msra.mxu0 %v669_v3 }
  0x5a   : > { %712 = vmatpush.msra.mxu1 %v685_v6 }
  0x5b   : > { %693 = vmatpush.msra.mxu0 %v668_v5 }
  0x5c   : > { %713 = vmatpush.msra.mxu1 %v684_v7 }
  0x5d   : > { %694 = vmatpush.msra.mxu0 %v667_v8 }
  0x5e   : > { %714 = vmatpush.msra.mxu1 %v683_v9 }
  0x5f   : > { %695 = vmatpush.msra.mxu0 %v666_v10 }
  0x60   : > { %715 = vmatpush.msra.mxu1 %v682_v11 }
  0x61   : > { %696 = vmatpush.msra.mxu0 %v665_v12 }
  0x62   : > { %716 = vmatpush.msra.mxu1 %v681_v13 }
  0x63   : > { %697 = vmatpush.msra.mxu0 %v664_v14 }
  0x64   : > { %717 = vmatpush.msra.mxu1 %v680_v15 }
  0x65   : > { %698 = vmatpush.msra.mxu0 %v663_v16 }
  0x66   : > { %718 = vmatpush.msra.mxu1 %v679_v18 }
  0x67   : > { %699 = vmatpush.msra.mxu0 %v662_v19 }
  0x68   : > { %719 = vmatpush.msra.mxu1 %v678_v38 }
  0x69   : > { %700 = vmatpush.msra.mxu0 %v661_v21 }
  0x6a   : > { %720 = vmatpush.msra.mxu1 %v677_v40 }
  0x6b   : > { %701 = vmatpush.msra.mxu0 %v660_v22 }
  0x6c   : > { %721 = vmatpush.msra.mxu1 %v676_v42 }
  0x6d   : > { %702 = vmatpush.msra.mxu0 %v659_v37 }
  0x6e   : > { %722 = vmatpush.msra.mxu1 %v675_v44 }
  0x6f   : > { %703 = vmatpush.msra.mxu0 %v658_v39 }
  0x70   : > { %723 = vmatpush.msra.mxu1 %v674_v46 }
  0x71   : > { %704 = vmatpush.msra.mxu0 %v657_v41 }
  0x72   : > { %724 = vmatpush.msra.mxu1 %v673_v47 }
  0x73   : > { %705 = vmatpush.msra.mxu0 %v656_v43 }
  0x74   : > { %725 = vmatpush.msra.mxu1 %v672_v48 }
  0x75   : > { %706 = vmatpush.msra.mxu0 %v655_v45 }
  0x76   : > { %726 = vmatpush.msra.mxu1 %v671_v49 }
  0xb2   : > { %v429_v23 = vpop.f32.mrf.mxu0 }
  0xb3   : > { %v430_v24 = vadd.f32 %v429_v23, %v408_v20 }
  0xb4   : > { %v449_v25 = vpop.f32.mrf.mxu1 }
  0xb5   : > { %v450_v28 = vadd.f32 %v449_v25, %v430_v24 }
  0xb7   : > { %v495_v29 = vmul.f32 %v494_v26, %v450_v28  ;;  %v469_v30 = vpop.f32.mrf.mxu2  ;;  %vm492_vm0 = vcmp.gt.f32.partialorder %v450_v28, 0.0 }
  0xb8   : > { %v470_v31 = vadd.f32 %v469_v30, %v409_v27 }
  0xb9   : > { %v489_v32 = vpop.f32.mrf.mxu3  ;;  %v497_v33 = vsel %vm492_vm0, %v450_v28, %v495_v29 }
  0xba   : > { %v490_v34 = vadd.f32 %v489_v32, %v470_v31  ;;  %585 = vmatmul.f32.vlgmr.msrb.gmra.mxu0 %v497_v33  ;;  %625 = vmatmul.f32.vlgmr.msrb.gmra.mxu2 %v497_v33 }
  0xbc   : > { %v496_v35 = vmul.f32 %v494_v26, %v490_v34  ;;  %vm493_vm1 = vcmp.gt.f32.partialorder %v490_v34, 0.0 }
  0xbe   : > { %v498_v36 = vsel %vm493_vm1, %v490_v34, %v496_v35 }
  0xbf   : > { %605 = vmatmul.f32.vlgmr.msrb.gmra.mxu1 %v498_v36  ;;  %645 = vmatmul.f32.vlgmr.msrb.gmra.mxu3 %v498_v36 }
 0x137   : > { %v586_v52 = vpop.f32.mrf.mxu0 }
 0x138   : > { %v587_v53 = vadd.f32 %v586_v52, %v565_v51 }
 0x13c   : > { %v606_v54 = vpop.f32.mrf.mxu1 }
 0x13d   : > { %v607_v55 = vadd.f32 %v606_v54, %v587_v53  ;;  %v626_v57 = vpop.f32.mrf.mxu2 }
 0x13e   : > { %v627_v59 = vadd.f32 %v626_v57, %v566_v56 }
 0x13f   : > { %vm649_vm2 = vcmp.gt.f32.partialorder %v607_v55, 0.0  ;;  %v651_v58 = vmul.f32 %v607_v55, %v494_v26 }
 0x141   : > { %v653_v60 = vsel %vm649_vm2, %v607_v55, %v651_v58 }
 0x142   : > { %v646_v61 = vpop.f32.mrf.mxu3  ;;  %707 = vmatmul.f32.vlgmr.msra.gmra.mxu0 %v653_v60 }
 0x143   : > { %v647_v62 = vadd.f32 %v646_v61, %v627_v59 }
 0x145   : > { %vm650_vm3 = vcmp.gt.f32.partialorder %v647_v62, 0.0  ;;  %v652_v63 = vmul.f32 %v647_v62, %v494_v26 }
 0x147   : > { %v654_v0 = vsel %vm650_vm3, %v647_v62, %v652_v63 }
 0x148   : > { %727 = vmatmul.f32.vlgmr.msra.gmra.mxu1 %v654_v0 }
 0x1bf   : > { %v708_v2 = vpop.f32.mrf.mxu0 }
 0x1c0   : > { %v709_v3 = vadd.f32 %v855_v1, %v708_v2 }
 0x1c5   : > { %v728_v4 = vpop.f32.mrf.mxu1 }
 0x1c6   : > { %v729_v5 = vadd.f32 %v728_v4, %v709_v3 }
 0x1c8   : > { %731 = vst [vmem:[%s338_s18] sm:$0xff] %v729_v5 }
 0x1c9 PF: > { %s21_s29 = sadd.s32 1, %s930_s29  }
 0x1ca   : > { %p18_p7 = scmp.ge.s32.totalorder %s21_s29, 6  }
 0x1cc   :  { %20 = sbr.rel (!%p18_p7) target bundleno = 4 (0x4), region = 91 }
 0x1d1   :  { %751 = vsyncpa [#allocation4], 1 }
 0x1d2   :  { %753 = vsyncpa [#allocation4 + $0x1], 1 }
 0x1d3   :  { %754 = vsyncpa [#allocation6], 1 }

</bundles_post_ra>
